<compile_context>
chip_gen: v6e
topology: v6e:2x2x1
jax: 0.10.0
libtpu: 0.0.40
codegen_flags: <defaults>
</compile_context>

<pallas_src>
import jax
import jax.numpy as jnp
from jax.experimental import pallas as pl
from jax.experimental.pallas import tpu as pltpu


ONE_HOT_MAX_V = 2048  # largest vocab routed to the MXU one-hot path


def _round_up(x: int, m: int) -> int:
    return (x + m - 1) // m * m


def _sublane(itemsize: int) -> int:
    # Dense (8,128)-tile sublane multiple: f32/u32 -> 8, bf16 -> 16, i8 -> 32.
    return {4: 8, 2: 16, 1: 32}.get(itemsize, 8)


def _vmem_physical_bytes() -> int:
    """Per-TensorCore physical VMEM, by device generation."""
    try:
        kind = jax.devices()[0].device_kind.lower()
    except Exception:
        kind = ""
    if "v7" in kind or "7x" in kind:
        return 64 << 20       # v7x: 64 MiB per TensorCore
    return 128 << 20          # v5e / v6e: 128 MiB


def _num_tensorcores() -> int:
    """TensorCores per chip (only used to decide megacore grid splitting)."""
    try:
        kind = jax.devices()[0].device_kind.lower()
    except Exception:
        return 1
    return 2 if any(t in kind for t in ("v7", "7x", "v4", "v5p")) else 1


# ----------------------------------------------------------------------------
# Path 1: VMEM-resident table, one-hot MXU gather (small vocab).
# ----------------------------------------------------------------------------
def _embed_onehot_kernel(ids_ref, table_hbm, out_ref, table_vmem, load_sem):
    # ids_ref:    VMEM (T, 1) int32 token ids for this grid step.
    # table_hbm:  ANY  (V, D) embedding table (stays in HBM).
    # out_ref:    VMEM (T, D) dense output block.
    # table_vmem: VMEM (V, D) scratch -- single-buffered resident table copy.
    # load_sem:   DMA semaphore for the one-time table load (per core).
    @pl.when(pl.program_id(1) == 0)
    def _():
        cp = pltpu.make_async_copy(table_hbm, table_vmem, load_sem)
        cp.start()
        cp.wait()

    t_block = out_ref.shape[0]
    vocab = table_vmem.shape[0]
    ids = ids_ref[...]                                             # (T, 1) int32
    iota = jax.lax.broadcasted_iota(jnp.int32, (t_block, vocab), 1)
    onehot = (ids == iota).astype(table_vmem.dtype)                # (T, V)
    out_ref[...] = jnp.dot(
        onehot, table_vmem[...], preferred_element_type=jnp.float32
    ).astype(out_ref.dtype)


# ----------------------------------------------------------------------------
# Path 2: VMEM-resident table, batched row gather with dense group stores.
# ----------------------------------------------------------------------------
def _make_resident_rowgather_kernel(sub: int):
    def kernel(ids_smem, table_hbm, out_ref, table_vmem, load_sem):
        # ids_smem:   SMEM int32[n_pad]  (scalar-prefetched token ids)
        # table_hbm:  ANY  (V, D)        (embedding table, stays in HBM)
        # out_ref:    VMEM (T, D)        dense output block
        # table_vmem: VMEM (V, D)        single-buffered resident table copy
        @pl.when(pl.program_id(1) == 0)
        def _():
            cp = pltpu.make_async_copy(table_hbm, table_vmem, load_sem)
            cp.start()
            cp.wait()

        t_block = out_ref.shape[0]
        npc = pl.num_programs(1)
        blk = pl.program_id(0) * npc + pl.program_id(1)
        base = blk * t_block

        def do_group(g, carry):
            start = pl.multiple_of(g * sub, sub)
            # Gather `sub` rows (scalar-indexed dynamic loads from the resident
            # table), then issue ONE dense (sub, D) store -- no masked stores.
            rows = [
                table_vmem[pl.ds(ids_smem[base + start + r], 1), :]
                for r in range(sub)
            ]
            out_ref[pl.ds(start, sub), :] = jnp.concatenate(rows, axis=0)
            return carry

        jax.lax.fori_loop(0, t_block // sub, do_group, 0, unroll=4)

    return kernel


# ----------------------------------------------------------------------------
# Path 3: table in HBM, manual double-buffered per-row DMA gather.
# ----------------------------------------------------------------------------
def _embed_dma_gather_kernel(ids_smem, table_hbm, out_ref, buf, sems):
    # ids_smem:  SMEM int32[n_pad]   (scalar-prefetched token ids)
    # table_hbm: ANY  (V, D)         (embedding table, stays in HBM)
    # out_ref:   VMEM (T, D)         dense output block for this step
    # buf:       VMEM (2, T, D)      double-buffered gather landing buffer
    # sems:      DMA  (2,)           one byte-counting semaphore per slot
    t_block = out_ref.shape[0]
    npc = pl.num_programs(1)
    j = pl.program_id(1)
    blk = pl.program_id(0) * npc + j
    slot = j % 2

    def issue_block(block_idx, dst_slot):
        base = block_idx * t_block

        def issue_row(t, carry):
            tok = ids_smem[base + t]
            pltpu.make_async_copy(
                table_hbm.at[pl.ds(tok, 1), :],
                buf.at[dst_slot, pl.ds(t, 1), :],
                sems.at[dst_slot],
            ).start()
            return carry

        jax.lax.fori_loop(0, t_block, issue_row, 0, unroll=4)

    # Per-core prologue: prime slot 0 with this core's first block.
    @pl.when(j == 0)
    def _():
        issue_block(blk, slot)

    # Prefetch the next block into the other slot (overlaps with this block's
    # DMAs / writeback -- classic double buffering).
    @pl.when(j + 1 < npc)
    def _():
        issue_block(blk + 1, 1 - slot)

    # Wait for all T row DMAs of the current block.  The DMA semaphore counts
    # bytes, so one wait with a (T, D)-shaped descriptor covers all T rows.
    pltpu.make_async_copy(
        table_hbm.at[pl.ds(0, t_block), :], buf.at[slot], sems.at[slot]
    ).wait()

    out_ref[...] = buf[slot]


# ----------------------------------------------------------------------------
# Wrappers
# ----------------------------------------------------------------------------
def _token_embedding_resident(flat_ids, table, *, one_hot: bool):
    (n_tokens,) = flat_ids.shape
    V, D = table.shape
    itemsize = jnp.dtype(table.dtype).itemsize
    sub = _sublane(itemsize)
    vmem_phys = _vmem_physical_bytes()

    # Token block T: sublane-dense, big enough to amortize ~0.35us/step grid
    # overhead and give large dense writeback DMAs.
    max_block_bytes = (2 << 20) if vmem_phys <= (64 << 20) else (4 << 20)
    T = max(sub, (max_block_bytes // max(1, D * itemsize)) // sub * sub)
    T = min(T, 1024)
    T = min(T, _round_up(n_tokens, sub))
    if one_hot:
        # Bound the (T, V) one-hot intermediate to ~2 MiB.
        t_v_cap = max(sub, ((2 << 20) // max(1, V * 4)) // sub * sub)
        T = min(T, t_v_cap)
    T = max(T, sub)

    table_bytes = V * D * itemsize
    out_block_bytes = T * D * itemsize

    # Megacore split only when the per-core writeback amortises the duplicated
    # per-core resident-table load (avoid a v7x regression for short seqs).
    n_cores = _num_tensorcores()
    C = n_cores if (n_cores > 1 and n_tokens * D * itemsize >= table_bytes) else 1

    n_pad = _round_up(n_tokens, C * T)
    if n_pad != n_tokens:
        flat_ids = jnp.pad(flat_ids, (0, n_pad - n_tokens))  # pads gather row 0
    npc = (n_pad // T) // C
    grid = (C, npc)

    vmem_limit = int(
        max(
            min(table_bytes + 2 * out_block_bytes + (16 << 20), vmem_phys - (4 << 20)),
            32 << 20,
        )
    )
    cparams = pltpu.CompilerParams(
        dimension_semantics=("parallel", "arbitrary"),
        vmem_limit_bytes=vmem_limit,
    )

    if one_hot:
        ids_col = flat_ids.reshape(n_pad, 1)
        out_flat = pl.pallas_call(
            _embed_onehot_kernel,
            out_shape=jax.ShapeDtypeStruct((n_pad, D), table.dtype),
            grid=grid,
            in_specs=[
                pl.BlockSpec((T, 1), lambda c, j: (c * npc + j, 0)),
                pl.BlockSpec(memory_space=pl.ANY),   # table: copied once per core
            ],
            out_specs=pl.BlockSpec((T, D), lambda c, j: (c * npc + j, 0)),
            scratch_shapes=[
                pltpu.VMEM((V, D), table.dtype),
                pltpu.SemaphoreType.DMA(()),
            ],
            compiler_params=cparams,
        )(ids_col, table)
    else:
        # TODO(synk): very large B*S can exceed SMEM for the scalar-prefetched
        # id array (pads to next_pow2(4N) bytes); a blocked SMEM id input per
        # step would lift that ceiling.
        out_flat = pl.pallas_call(
            _make_resident_rowgather_kernel(sub),
            out_shape=jax.ShapeDtypeStruct((n_pad, D), table.dtype),
            grid_spec=pltpu.PrefetchScalarGridSpec(
                num_scalar_prefetch=1,
                grid=grid,
                in_specs=[pl.BlockSpec(memory_space=pl.ANY)],
                out_specs=pl.BlockSpec((T, D), lambda c, j, ids: (c * npc + j, 0)),
                scratch_shapes=[
                    pltpu.VMEM((V, D), table.dtype),
                    pltpu.SemaphoreType.DMA(()),
                ],
            ),
            compiler_params=cparams,
        )(flat_ids, table)

    return out_flat[:n_tokens]


def _token_embedding_resident_rowgather(flat_ids, table):
    V, D = table.shape
    if jnp.dtype(table.dtype).itemsize == 2 and D % 2 == 0:
        # View 16-bit rows as uint32 so single-row copies stay 32-bit
        # sublane-dense (no packed-sublane read-modify-write for bf16/fp16).
        table32 = jax.lax.bitcast_convert_type(
            table.reshape(V, D // 2, 2), jnp.uint32
        )
        out32 = _token_embedding_resident(flat_ids, table32, one_hot=False)
        out16 = jax.lax.bitcast_convert_type(out32, table.dtype)  # (N, D//2, 2)
        return out16.reshape(-1, D)
    return _token_embedding_resident(flat_ids, table, one_hot=False)


def _token_embedding_dma_gather(flat_ids, table):
    (n_tokens,) = flat_ids.shape
    V, D = table.shape
    itemsize = jnp.dtype(table.dtype).itemsize
    sub = _sublane(itemsize)
    vmem_phys = _vmem_physical_bytes()

    # T rows per block: many outstanding row DMAs to hide HBM gather latency,
    # with a modest (2, T, D) landing buffer + double-buffered output block.
    T = max(sub, ((1 << 20) // max(1, D * itemsize)) // sub * sub)
    T = min(T, 256)
    T = min(T, _round_up(n_tokens, sub))
    if V >= sub:
        T = min(T, (V // sub) * sub)  # grouped-wait dummy slices T table rows
    T = max(T, sub)

    C = _num_tensorcores()            # rows independent -> split blocks per core
    n_pad = _round_up(n_tokens, C * T)
    if n_pad != n_tokens:
        flat_ids = jnp.pad(flat_ids, (0, n_pad - n_tokens))
    npc = (n_pad // T) // C

    vmem_limit = int(
        max(
            min(4 * T * D * itemsize + (16 << 20), vmem_phys - (4 << 20)),
            32 << 20,
        )
    )

    out_flat = pl.pallas_call(
        _embed_dma_gather_kernel,
        out_shape=jax.ShapeDtypeStruct((n_pad, D), table.dtype),
        grid_spec=pltpu.PrefetchScalarGridSpec(
            num_scalar_prefetch=1,
            grid=(C, npc),
            in_specs=[pl.BlockSpec(memory_space=pl.ANY)],
            out_specs=pl.BlockSpec((T, D), lambda c, j, ids: (c * npc + j, 0)),
            scratch_shapes=[
                pltpu.VMEM((2, T, D), table.dtype),
                pltpu.SemaphoreType.DMA((2,)),
            ],
        ),
        compiler_params=pltpu.CompilerParams(
            dimension_semantics=("parallel", "arbitrary"),
            vmem_limit_bytes=vmem_limit,
        ),
    )(flat_ids, table)
    return out_flat[:n_tokens]


def token_embedding(ids, emb_table, *, force_hbm_gather: bool = False):
    """Pallas equivalent of nn.Embedding(vocab, d_model)(ids): (B, S) -> (B, S, D)."""
    B, S = ids.shape
    V, D = emb_table.shape
    flat_ids = ids.reshape(-1).astype(jnp.int32)
    # PyTorch raises on out-of-range ids; we clamp instead of doing an
    # unchecked OOB VMEM read / OOB data-dependent DMA.
    flat_ids = jnp.clip(flat_ids, 0, V - 1)

    itemsize = jnp.dtype(emb_table.dtype).itemsize
    table_bytes = V * D * itemsize
    # Single-buffered resident table (manual DMA into scratch), so the budget
    # only needs headroom for out blocks / one-hot temps / compiler scratch:
    # ~40 MiB tables on v7x, ~104 MiB on v5e/v6e take the fast resident path.
    resident_budget = _vmem_physical_bytes() - (24 << 20)

    if force_hbm_gather or table_bytes > resident_budget:
        out_flat = _token_embedding_dma_gather(flat_ids, emb_table)
    elif V <= ONE_HOT_MAX_V:
        out_flat = _token_embedding_resident(flat_ids, emb_table, one_hot=True)
    else:
        out_flat = _token_embedding_resident_rowgather(flat_ids, emb_table)

    return out_flat.reshape(B, S, D)


if __name__ == "__main__":
    key = jax.random.PRNGKey(0)
    k1, k2, k3, k4 = jax.random.split(key, 4)

    # --- Case 1: small vocab -> VMEM-resident one-hot MXU path -------------
    V1, D1, B1, S1 = 64, 128, 2, 8
    tbl1 = jax.random.normal(k1, (V1, D1), dtype=jnp.float32)  # nn.Embedding ~ N(0,1)
    ids1 = jax.random.randint(k2, (B1, S1), 0, V1, dtype=jnp.int32)
    ref1 = jnp.take(tbl1, ids1, axis=0)
    out1 = jax.block_until_ready(token_embedding(ids1, tbl1))
    assert out1.shape == (B1, S1, D1) and out1.dtype == tbl1.dtype
    assert jnp.allclose(out1, ref1), "one-hot resident path mismatch"

    # --- Case 2: larger vocab -> VMEM-resident batched row-gather path -----
    V2, D2, B2, S2 = 4096, 128, 2, 24
    tbl2 = jax.random.normal(k3, (V2, D2), dtype=jnp.float32)
    ids2 = jax.random.randint(k4, (B2, S2), 0, V2, dtype=jnp.int32)
    ref2 = jnp.take(tbl2, ids2, axis=0)
    out2 = jax.block_until_ready(token_embedding(ids2, tbl2))
    assert jnp.allclose(out2, ref2), "resident row-gather path mismatch"

    # bf16 variant exercises the uint32-repacked row copies.
    tbl2b = tbl2.astype(jnp.bfloat16)
    out2b = jax.block_until_ready(token_embedding(ids2, tbl2b))
    assert jnp.array_equal(out2b, jnp.take(tbl2b, ids2, axis=0)), "bf16 row-gather mismatch"

    # --- Case 3: forced HBM double-buffered DMA gather (huge-vocab path) ---
    out3 = jax.block_until_ready(token_embedding(ids1, tbl1, force_hbm_gather=True))
    assert jnp.allclose(out3, ref1), "HBM DMA-gather fallback mismatch"

    print("KERNEL_OK")
</pallas_src>

<mosaic_0001>
module attributes {stable_mosaic.version = 11 : i64} {
  func.func @_embed_onehot_kernel(%arg0: i32, %arg1: i32, %arg2: memref<16x1xi32, #tpu.memory_space<vmem>>, %arg3: memref<64x128xf32, #tpu.memory_space<any>>, %arg4: memref<16x128xf32, #tpu.memory_space<vmem>>, %arg5: memref<64x128xf32, #tpu.memory_space<vmem>>, %arg6: memref<!tpu.dma_semaphore, #tpu.memory_space<semaphore_mem>>) attributes {dimension_semantics = [#tpu.dimension_semantics<parallel>, #tpu.dimension_semantics<arbitrary>], iteration_bounds = array<i64: 1, 1>, scalar_prefetch = 0 : i64, scratch_operands = 2 : i64, tpu.core_type = #tpu.core_type<tc>, window_params = [{transform_indices = @transform_0, window_bounds = array<i64: 16, 1>}, {}, {transform_indices = @transform_2, window_bounds = array<i64: 16, 128>}]} {
    %c0_i32 = arith.constant 0 : i32
    %0 = arith.cmpi eq, %arg1, %c0_i32 : i32
    %1 = arith.extui %0 : i1 to i32
    %c0_i32_0 = arith.constant 0 : i32
    %2 = arith.cmpi ne, %1, %c0_i32_0 : i32
    scf.if %2 {
      tpu.enqueue_dma source(%arg3 : memref<64x128xf32, #tpu.memory_space<any>>) target(%arg5 : memref<64x128xf32, #tpu.memory_space<vmem>>) target_semaphore(%arg6 : memref<!tpu.dma_semaphore, #tpu.memory_space<semaphore_mem>>)
      tpu.wait_dma2 semaphore(%arg6 : memref<!tpu.dma_semaphore, #tpu.memory_space<semaphore_mem>>) src(%arg3 : memref<64x128xf32, #tpu.memory_space<any>>) dst(%arg5 : memref<64x128xf32, #tpu.memory_space<vmem>>)
    } else {
    }
    %c0 = arith.constant 0 : index
    %c0_1 = arith.constant 0 : index
    %3 = vector.load %arg2[%c0, %c0_1] : memref<16x1xi32, #tpu.memory_space<vmem>>, vector<16x1xi32>
    %4 = tpu.iota {dimensions = array<i32: 1>} : vector<16x64xi32>
    %5 = vector.broadcast %3 : vector<16x1xi32> to vector<16x64xi32>
    %6 = arith.cmpi eq, %5, %4 : vector<16x64xi32>
    %7 = arith.extui %6 : vector<16x64xi1> to vector<16x64xi32>
    %8 = arith.sitofp %7 : vector<16x64xi32> to vector<16x64xf32>
    %c0_2 = arith.constant 0 : index
    %c0_3 = arith.constant 0 : index
    %9 = vector.load %arg5[%c0_2, %c0_3] : memref<64x128xf32, #tpu.memory_space<vmem>>, vector<64x128xf32>
    %cst = arith.constant dense<0.000000e+00> : vector<16x128xf32>
    %10 = tpu.matmul %8, %9, %cst {dimension_numbers = #tpu.dot_dimension_numbers<[1], [0], [0], [1], [0, 0, 1, 1], [], []>} : vector<16x64xf32>, vector<64x128xf32>, vector<16x128xf32> -> vector<16x128xf32>
    %c0_4 = arith.constant 0 : index
    %c0_5 = arith.constant 0 : index
    %11 = vector.load %arg4[%c0_4, %c0_5] : memref<16x128xf32, #tpu.memory_space<vmem>>, vector<16x128xf32>
    tpu.vector_store %arg4[%c0_4, %c0_5], %10 {strides = array<i32>} : memref<16x128xf32, #tpu.memory_space<vmem>>, vector<16x128xf32>,
    return
  }
  func.func @transform_0(%arg0: i32, %arg1: i32) -> (i32, i32) {
    %c1_i32 = arith.constant 1 : i32
    %0 = arith.muli %arg0, %c1_i32 : i32
    %1 = arith.addi %0, %arg1 : i32
    %c0_i32 = arith.constant 0 : i32
    %c0_i32_0 = arith.constant 0 : i32
    return %1, %c0_i32 : i32, i32
  }
  func.func @transform_2(%arg0: i32, %arg1: i32) -> (i32, i32) {
    %c1_i32 = arith.constant 1 : i32
    %0 = arith.muli %arg0, %c1_i32 : i32
    %1 = arith.addi %0, %arg1 : i32
    %c0_i32 = arith.constant 0 : i32
    %c0_i32_0 = arith.constant 0 : i32
    return %1, %c0_i32 : i32, i32
  }
}

</mosaic_0001>

<bundles_post_ra>
// kernel: tpu_custom_call.1
= control target key start
LH: loop header
LB: loop body
LE: loop exit
PB: predicated region body
PF: predicated region fallthrough
CT: control target
= control target key end

     0   :  { %7 = vsyncpa [#allocation5], 0  ;;  %s277_s9 = smov [#allocation2]   ;;  %s310_s0 = inlined_call_operand.vmem [shape: s32[16,1], index: 0, kind: input, shape index: {}]   ;;  %s311_s1 = inlined_call_operand.hbm [shape: f32[64,128], index: 1, kind: input, shape index: {}]   ;;  %s312_s2 = inlined_call_operand.hbm [shape: f32[16,128], index: 2, kind: output, shape index: {}]  }
   0x1   :  { %s45_s10 = sshll.u32 %s277_s9, 4  ;;  %s46_s10 = int_to_ptr.vmem [resolvable:$true] %s45_s10 }
   0x2   :  { %s241_s11 = scalar_lea.vmem %s46_s10, 1024  ;;  %p246_p1 = scmp.lt.s32.totalorder %s46_s10, %s46_s10 }
   0x3   :  { %p242_p0 = scmp.ne.s32.totalorder %s46_s10, %s241_s11  ;;  %p247_p2 = scmp.lt.s32.totalorder %s241_s11, %s241_s11 }
   0x5   :  { %p248_p3 = por %p247_p2, %p246_p1 }
   0x7   :  { %p249_p4 = pnand %p248_p3, %p242_p0 }
   0x9   :  { %252 = shalt.err (!%p249_p4)  }
   0xa   :  { %48 = dma.hbm_to_vmem [thread:$0]  %s311_s1, 1024, %s46_s10, [#allocation3] }
   0xb   :  { %273 = dma.done.wait [#allocation3], 1024 }
   0xc   :  { %274 = vsyncadd [#allocation3], 4294966272  ;;  %v278_v0 = vmov 0   ;;  %v52_v1 = vld [vmem:[%s310_s0] sm:$0xff]  ;;  %v75_v2 = vld [vmem:[#allocation2 + $0x38] sm:$0xff]  ;;  %v54_v11 = vlaneseq  ;;  %vm76_vm0 = vcmask 523264  }
   0xd   :  { %232 = vset.pattern.permute.xlu0 %v278_v0  ;;  %207 = vmatprep.subr.mxu0 %v75_v2  ;;  %v74_v3 = vld [vmem:[#allocation2 + $0x30] sm:$0xff]  ;;  %v53_v4 = vld [vmem:[%s310_s0 + $0x8] sm:$0xff]  ;;  %v72_v6 = vld [vmem:[#allocation2 + $0x20] sm:$0xff]  ;;  %v279_v14 = vmov 0.0   ;;  %s280_s0 = smov [#allocation4]  }
   0xe   :  { %57 = vperm.xlu0 %232, %v52_v1   ;;  %208 = vmatpush3.msra.mxu0 %v75_v2  ;;  %v73_v5 = vld [vmem:[#allocation2 + $0x28] sm:$0xff]  ;;  %v71_v7 = vld [vmem:[#allocation2 + $0x18] sm:$0xff]  ;;  %v70_v8 = vld [vmem:[#allocation2 + $0x10] sm:$0xff]  ;;  %v55_v12 = vand.u32 127, %v54_v11  ;;  %s169_s1 = sshll.u32 %s280_s0, 4  ;;  %s170_s1 = int_to_ptr.vmem [resolvable:$true] %s169_s1 }
   0xf   :  { %209 = vmatprep.subr.mxu0 %v74_v3  ;;  %v69_v9 = vld [vmem:[#allocation2 + $0x8] sm:$0xff]  ;;  %v68_v10 = vld [vmem:[#allocation2] sm:$0xff]  ;;  %s253_s18 = scalar_lea.vmem %s170_s1, 256  ;;  %p258_p6 = scmp.lt.s32.totalorder %s170_s1, %s170_s1 }
  0x10   :  { %210 = vmatpush3.msra.mxu0 %v74_v3  ;;  %p254_p5 = scmp.ne.s32.totalorder %s170_s1, %s253_s18  ;;  %p259_p7 = scmp.lt.s32.totalorder %s253_s18, %s253_s18 }
  0x11   :  { %211 = vmatprep.subr.mxu0 %v73_v5 }
  0x12   :  { %60 = vperm.xlu0 %232, %v53_v4   ;;  %212 = vmatpush3.msra.mxu0 %v73_v5  ;;  %p260_p8 = por %p259_p7, %p258_p6 }
  0x13   :  { %213 = vmatprep.subr.mxu0 %v72_v6 }
  0x14   :  { %214 = vmatpush3.msra.mxu0 %v72_v6  ;;  %p261_p9 = pnand %p260_p8, %p254_p5 }
  0x15   :  { %215 = vmatprep.subr.mxu0 %v71_v7 }
  0x16   :  { %216 = vmatpush3.msra.mxu0 %v71_v7 }
  0x17   :  { %217 = vmatprep.subr.mxu0 %v70_v8 }
  0x18   :  { %218 = vmatpush3.msra.mxu0 %v70_v8 }
  0x19   :  { %219 = vmatprep.subr.mxu0 %v69_v9 }
  0x1a   :  { %220 = vmatpush3.msra.mxu0 %v69_v9 }
  0x1b   :  { %221 = vmatprep.subr.mxu0 %v68_v10 }
  0x1c   :  { %222 = vmatpush3.msra.mxu0 %v68_v10 }
  0x89   :  { %v58_v13 = vpop.permute.xlu0 %57 }
  0x8a   :  { %vm62_vm1 = vcmp.eq.s32.totalorder %v58_v13, %v55_v12 }
  0x8b   :  { %v192_v15 = vsel %vm62_vm1, 1.0, %v279_v14 }
  0x8c   :  { %223 = vmatprep.mubr.msk.f32.mxu0 %vm76_vm0, %v192_v15 }
  0x8d   :  { %v61_v16 = vpop.permute.xlu0 %60 }
  0x8e   :  { %vm63_vm2 = vcmp.eq.s32.totalorder %v61_v16, %v55_v12 }
  0x8f   :  { %v193_v17 = vsel %vm63_vm2, 1.0, %v279_v14 }
  0x90   :  { %224 = vmatmul.mubr.msk.f32.vlgmr.msra.gmra.mxu0 %vm76_vm0, %v193_v17 }
 0x150   :  { %v225_v18 = vpop.f32.mrf.mxu0 }
 0x151   :  { %159 = vst [vmem:[#allocation4 + $0x8] sm:$0xff] %v225_v18 }
 0x152   :  { %v149_v19 = vpop.f32.mrf.mxu0 }
 0x153   :  { %158 = vst [vmem:[#allocation4] sm:$0xff] %v149_v19 }
 0x154   :  { %264 = shalt.err (!%p261_p9)
}
 0x155   :  { %s281_s19 = smov 128   ;;  %s282_s20 = smov 8  }
 0x156   :  { %175 = dma.vmem_to_hbm [thread:$0]  %s170_s1, 256, %s312_s2, [#allocation5], %s281_s19, %s281_s19, %s282_s20  }
 0x157   :  { %275 = dma.done.wait [#allocation5], 256  }
 0x158   :  { %276 = vsyncadd [#allocation5], 4294967040 }
 0x159   :  { %179 = vsyncpa [#allocation5], 1 }
 0x15a   :  { %180 = vsyncmov [#allocation3] }
 0x15d   :  { %s181_s23 = vpop.sfrf %180 }
 0x15e   :  { %p196_p10 = scmp.ne.s32.totalorder %s181_s23, 0 }
 0x160   :  { %185 = shalt.err (%p196_p10)  }

</bundles_post_ra>
